<compile_context>
chip_gen: v7x
topology: tpu7x:2x2x1
jax: 0.10.0
libtpu: 0.0.40
codegen_flags: <defaults>
</compile_context>

<pallas_src>
import math
import jax
import jax.numpy as jnp
from jax.experimental import pallas as pl
from jax.experimental.pallas import tpu as pltpu

LANE = 128
SUBLANE = 8


def _round_up(x, m):
    return ((x + m - 1) // m) * m


# ----------------------------------------------------------------------------- kernel


def _make_kernel(level_meta, has_prev, Hpad, compute_dtype):
    """level_meta: tuple of (L, Lpad, out_off, prev_Lpad, prev_off) per level (static)."""
    n_levels = len(level_meta)

    def kernel(*refs):
        if has_prev:
            x_ref, w1x_ref, w1p_ref, b1_ref, w2_ref, b2_ref, out_ref = refs
        else:
            x_ref, w1x_ref, b1_ref, w2_ref, b2_ref, out_ref = refs
            w1p_ref = None

        # One wide MXU matmul for every level's first-layer x contribution
        # (N = NL*Hpad instead of NL serial N=Hpad matmuls).  x streams straight
        # from VMEM; H_all is an f32 accumulator with the biases folded in.
        h_all = jnp.dot(x_ref[...], w1x_ref[...],
                        preferred_element_type=jnp.float32) + b1_ref[...]

        oh = None  # previous level's one-hot, stays on-chip for the whole hierarchy
        for i, (L, Lpad, off, pLpad, p_off) in enumerate(level_meta):
            # 128-aligned lane slice of the shared hidden activations (free).
            h = h_all[:, i * Hpad:(i + 1) * Hpad]
            if i > 0:
                # Small serial correction: previous one-hot through W1_prev.
                h = h + jnp.dot(oh, w1p_ref[p_off:p_off + pLpad, :],
                                preferred_element_type=jnp.float32)

            # Second Linear: logits for this level.
            y = jnp.dot(h.astype(compute_dtype), w2_ref[:, off:off + Lpad],
                        preferred_element_type=jnp.float32) + b2_ref[:, off:off + Lpad]

            # Lane-dense store into the packed logits slab (off, Lpad multiples of 128).
            out_ref[:, off:off + Lpad] = y.astype(out_ref.dtype)

            # OutputNormalization: one_hot(argmax over the *real* L classes),
            # first-max-index tie-break, entirely in-register.  Skip after last level.
            if i + 1 < n_levels:
                lane = jax.lax.broadcasted_iota(jnp.int32, y.shape, 1)
                valid = lane < L
                y_m = jnp.where(valid, y, -jnp.inf)
                row_max = jnp.max(y_m, axis=-1, keepdims=True)
                first_idx = jnp.min(
                    jnp.where(valid & (y_m == row_max), lane, Lpad),
                    axis=-1, keepdims=True)
                oh = (lane == first_idx).astype(compute_dtype)

    return kernel


# ----------------------------------------------------------------------------- parameter prep


def prepare_params(params, input_size, hidden_size, levels_size,
                   compute_dtype=jnp.bfloat16):
    """Pack every level's weights into (at most) 5 lane/sublane-padded arrays:
       W1x_all [Dpad, NL*Hpad], W1prev_all [sum(prev_Lpad), Hpad],
       b1_all [1, NL*Hpad] (f32), W2_all [Hpad, total_pad], b2_all [1, total_pad] (f32)."""
    NL = len(levels_size)
    Dpad = _round_up(input_size, LANE)
    Hpad = _round_up(hidden_size, LANE)
    Lpads = [_round_up(L, LANE) for L in levels_size]
    total_pad = sum(Lpads)
    prev_Ls = [0] + list(levels_size[:-1])
    prev_Lpads = [0] + Lpads[:-1]
    P_total = sum(prev_Lpads[1:])
    has_prev = P_total > 0

    w1x_all = jnp.zeros((Dpad, NL * Hpad), jnp.float32)
    b1_all = jnp.zeros((1, NL * Hpad), jnp.float32)
    w2_all = jnp.zeros((Hpad, total_pad), jnp.float32)
    b2_all = jnp.zeros((1, total_pad), jnp.float32)
    w1p_all = (jnp.zeros((P_total, Hpad), jnp.float32) if has_prev else None)

    level_meta = []
    out_off = 0
    p_off = 0
    for i, ((w1, b1, w2, b2), L) in enumerate(zip(params, levels_size)):
        Lpad = Lpads[i]
        pL = prev_Ls[i]
        pLpad = prev_Lpads[i]

        w1 = jnp.asarray(w1, jnp.float32)          # [prev_L + input_size, hidden]
        # torch.cat((one_hot, x), dim=1) order: rows [0:prev_L] <- one-hot, rows [prev_L:] <- x.
        w1x_all = w1x_all.at[:input_size, i * Hpad:i * Hpad + hidden_size].set(w1[pL:, :])
        if i > 0:
            w1p_all = w1p_all.at[p_off:p_off + pL, :hidden_size].set(w1[:pL, :])
        b1_all = b1_all.at[0, i * Hpad:i * Hpad + hidden_size].set(
            jnp.asarray(b1, jnp.float32).reshape(-1))
        w2_all = w2_all.at[:hidden_size, out_off:out_off + L].set(
            jnp.asarray(w2, jnp.float32))
        b2_all = b2_all.at[0, out_off:out_off + L].set(
            jnp.asarray(b2, jnp.float32).reshape(-1))

        level_meta.append((L, Lpad, out_off, pLpad, p_off))
        out_off += Lpad
        if i > 0:
            p_off += pLpad

    flat = [w1x_all.astype(compute_dtype)]
    if has_prev:
        flat.append(w1p_all.astype(compute_dtype))
    flat += [b1_all, w2_all.astype(compute_dtype), b2_all]
    return flat, tuple(level_meta), has_prev, Dpad, Hpad, total_pad


# ----------------------------------------------------------------------------- tiling / VMEM budget


def _choose_batch_tile(B, vmem_cap, weight_bytes, Dpad, Hpad, NL, total_pad,
                       max_Lpad, compute_itemsize, out_itemsize):
    """Generation-aware batch tile: largest 128-multiple that fits ~80% of VMEM,
       accounting for double-buffered resident weights + x/out tiles + f32 working set,
       with >=2 tiles when the batch is large enough (v7x megacore / DMA overlap)."""
    sub = 16 if compute_itemsize == 2 else SUBLANE
    b_min = _round_up(max(B, 1), sub)

    budget = int(0.80 * vmem_cap)
    avail = budget - 2 * weight_bytes                    # weights are double-buffered by default
    per_row = (2 * Dpad * compute_itemsize               # double-buffered x tile
               + 2 * total_pad * out_itemsize            # double-buffered out tile
               + (NL * Hpad + Hpad + 2 * max_Lpad) * 4)  # f32 H_all / h / y / one-hot working set

    tb = 128
    for cand in (1024, 512, 256, 128):
        if cand * per_row <= avail:
            tb = cand
            break

    if b_min <= tb:
        # Single tile == full (padded) array; safe for any sublane count.
        return b_min, b_min

    # At least 2 batch tiles so dimension_semantics=("parallel",) can actually split
    # work across v7x's two TensorCores and x/out DMAs overlap compute.
    while tb > 128 and _round_up(B, tb) // tb < 2:
        tb //= 2
    return tb, _round_up(B, tb)


# ----------------------------------------------------------------------------- forward


def localbylevel_forward(x, params, levels_size, input_size, hidden_size,
                         compute_dtype=jnp.bfloat16):
    """LocalbyLevelModel.forward: returns list of per-level logits [B, L_i]."""
    B = x.shape[0]
    out_dtype = x.dtype   # keep the module's f32 logits contract when x is f32

    flat_w, level_meta, has_prev, Dpad, Hpad, total_pad = prepare_params(
        params, input_size, hidden_size, levels_size, compute_dtype)
    NL = len(levels_size)
    max_Lpad = max(m[1] for m in level_meta)
    weight_bytes = sum(int(w.size) * jnp.dtype(w.dtype).itemsize for w in flat_w)
    compute_itemsize = jnp.dtype(compute_dtype).itemsize
    out_itemsize = jnp.dtype(out_dtype).itemsize

    try:
        vmem_cap = int(pltpu.get_tpu_info().vmem_capacity_bytes)
    except Exception:  # pragma: no cover - conservative fallback (v7x per-TC size)
        vmem_cap = 64 * 1024 * 1024

    TB, Bpad = _choose_batch_tile(B, vmem_cap, weight_bytes, Dpad, Hpad, NL,
                                  total_pad, max_Lpad, compute_itemsize, out_itemsize)

    # Single-copy padding of x (no extra HBM round trip when shapes already align).
    xc = x.astype(compute_dtype)
    pad_b, pad_d = Bpad - B, Dpad - input_size
    x_pad = jnp.pad(xc, ((0, pad_b), (0, pad_d))) if (pad_b or pad_d) else xc

    grid = (Bpad // TB,)
    x_spec = pl.BlockSpec((TB, Dpad), lambda b: (b, 0))
    w_specs = [pl.BlockSpec(w.shape, lambda b: (0, 0)) for w in flat_w]  # resident weights
    out_spec = pl.BlockSpec((TB, total_pad), lambda b: (b, 0))

    # Advisory cost estimate for XLA's scheduler.
    flops = 2 * Bpad * Dpad * (NL * Hpad)
    for (L, Lpad, off, pLpad, p_off) in level_meta:
        flops += 2 * Bpad * Hpad * Lpad + 2 * Bpad * pLpad * Hpad
    bytes_accessed = (int(x_pad.size) * compute_itemsize + weight_bytes
                      + Bpad * total_pad * out_itemsize)
    cost = pl.CostEstimate(flops=int(flops), transcendentals=0,
                           bytes_accessed=int(bytes_accessed))

    # VMEM limit: double-buffered weights + double-buffered x/out tiles + f32 working set,
    # with headroom, capped at ~90% of this generation's physical VMEM.
    per_tile = TB * (Dpad * compute_itemsize + total_pad * out_itemsize)
    needed = (2 * weight_bytes + 2 * per_tile
              + TB * (NL * Hpad + Hpad + 2 * max_Lpad) * 4)
    vmem_limit = int(min(int(0.9 * vmem_cap), max(2 * needed, 32 * 1024 * 1024)))

    kernel = _make_kernel(level_meta, has_prev, Hpad, compute_dtype)

    out = pl.pallas_call(
        kernel,
        out_shape=jax.ShapeDtypeStruct((Bpad, total_pad), out_dtype),
        grid=grid,
        in_specs=[x_spec] + w_specs,
        out_specs=out_spec,
        compiler_params=pltpu.CompilerParams(
            dimension_semantics=("parallel",),
            vmem_limit_bytes=vmem_limit,
        ),
        cost_estimate=cost,
    )(x_pad, *flat_w)

    # Slice each level's real logits out of the packed slab.
    return [out[:B, off:off + L] for (L, _, off, _, _) in level_meta]


# ----------------------------------------------------------------------------- init (matches torch)


def kaiming_uniform(key, shape, fan_in, a=0.01, dtype=jnp.float32):
    # torch.nn.init.kaiming_uniform_(w, a=0.01), fan_in mode, leaky_relu gain.
    gain = math.sqrt(2.0 / (1.0 + a * a))
    bound = gain * math.sqrt(3.0 / fan_in)
    return jax.random.uniform(key, shape, dtype=dtype, minval=-bound, maxval=bound)


def init_params(key, levels_size, input_size, hidden_size, dtype=jnp.float32):
    """One (W1, b1, W2, b2) per level; weights stored transposed as [in, out]."""
    params = []
    next_size = 0
    for level_size in levels_size:
        in_dim = input_size + next_size
        key, k1, k2 = jax.random.split(key, 3)
        w1 = kaiming_uniform(k1, (in_dim, hidden_size), fan_in=in_dim, dtype=dtype)
        b1 = jnp.zeros((hidden_size,), dtype=dtype)
        w2 = kaiming_uniform(k2, (hidden_size, level_size), fan_in=hidden_size, dtype=dtype)
        b2 = jnp.zeros((level_size,), dtype=dtype)
        params.append((w1, b1, w2, b2))
        next_size = level_size
    return params


# ----------------------------------------------------------------------------- reference (same bf16 path)


def reference_forward(x, params, compute_dtype=jnp.bfloat16):
    outputs = []
    current_output = None
    xc = x.astype(compute_dtype)
    for i, (w1, b1, w2, b2) in enumerate(params):
        inp = xc if i == 0 else jnp.concatenate(
            [current_output.astype(compute_dtype), xc], axis=1)
        h = jnp.dot(inp, w1.astype(compute_dtype),
                    preferred_element_type=jnp.float32) + b1.reshape(1, -1)
        y = jnp.dot(h.astype(compute_dtype), w2.astype(compute_dtype),
                    preferred_element_type=jnp.float32) + b2.reshape(1, -1)
        outputs.append(y.astype(x.dtype))
        idx = jnp.argmax(y, axis=1)
        current_output = jax.nn.one_hot(idx, y.shape[1], dtype=x.dtype)
    return outputs


# ----------------------------------------------------------------------------- demo / test

if __name__ == "__main__":
    batch = 8
    input_size = 32
    hidden_size = 16
    levels_size = [8, 12, 6]

    key = jax.random.PRNGKey(0)
    key, kx, kp = jax.random.split(key, 3)
    x = jax.random.normal(kx, (batch, input_size), dtype=jnp.float32)
    params = init_params(kp, levels_size, input_size, hidden_size)

    outputs = localbylevel_forward(x, params, levels_size, input_size, hidden_size)
    outputs = jax.block_until_ready(outputs)

    refs = reference_forward(x, params)
    assert len(outputs) == len(levels_size)
    for out, ref, ls in zip(outputs, refs, levels_size):
        assert out.shape == (batch, ls), (out.shape, ls)
        assert out.dtype == jnp.float32
        assert bool(jnp.all(jnp.isfinite(out)))
        assert bool(jnp.allclose(out, ref, rtol=2e-2, atol=2e-2)), (
            float(jnp.max(jnp.abs(out - ref))))

    print("KERNEL_OK")
</pallas_src>

<mosaic_0001>
module attributes {stable_mosaic.version = 11 : i64} {
  func.func @kernel(%arg0: i32, %arg1: memref<16x128xbf16, #tpu.memory_space<vmem>>, %arg2: memref<128x384xbf16, #tpu.memory_space<vmem>>, %arg3: memref<256x128xbf16, #tpu.memory_space<vmem>>, %arg4: memref<1x384xf32, #tpu.memory_space<vmem>>, %arg5: memref<128x384xbf16, #tpu.memory_space<vmem>>, %arg6: memref<1x384xf32, #tpu.memory_space<vmem>>, %arg7: memref<16x384xf32, #tpu.memory_space<vmem>>) attributes {dimension_semantics = [#tpu.dimension_semantics<parallel>], iteration_bounds = array<i64: 1>, scalar_prefetch = 0 : i64, scratch_operands = 0 : i64, tpu.core_type = #tpu.core_type<tc>, window_params = [{transform_indices = @transform_0, window_bounds = array<i64: 16, 128>}, {pipeline_mode = #tpu.pipeline_mode<synchronous>, transform_indices = @transform_1, window_bounds = array<i64: 128, 384>}, {pipeline_mode = #tpu.pipeline_mode<synchronous>, transform_indices = @transform_2, window_bounds = array<i64: 256, 128>}, {pipeline_mode = #tpu.pipeline_mode<synchronous>, transform_indices = @transform_3, window_bounds = array<i64: 1, 384>}, {pipeline_mode = #tpu.pipeline_mode<synchronous>, transform_indices = @transform_4, window_bounds = array<i64: 128, 384>}, {pipeline_mode = #tpu.pipeline_mode<synchronous>, transform_indices = @transform_5, window_bounds = array<i64: 1, 384>}, {transform_indices = @transform_6, window_bounds = array<i64: 16, 384>}]} {
    %c0 = arith.constant 0 : index
    %c0_0 = arith.constant 0 : index
    %0 = vector.load %arg1[%c0, %c0_0] : memref<16x128xbf16, #tpu.memory_space<vmem>>, vector<16x128xbf16>
    %c0_1 = arith.constant 0 : index
    %c0_2 = arith.constant 0 : index
    %1 = vector.load %arg2[%c0_1, %c0_2] : memref<128x384xbf16, #tpu.memory_space<vmem>>, vector<128x384xbf16>
    %cst = arith.constant dense<0.000000e+00> : vector<16x384xf32>
    %2 = tpu.matmul %0, %1, %cst {dimension_numbers = #tpu.dot_dimension_numbers<[1], [0], [0], [1], [0, 0, 1, 1], [], []>} : vector<16x128xbf16>, vector<128x384xbf16>, vector<16x384xf32> -> vector<16x384xf32>
    %c0_3 = arith.constant 0 : index
    %c0_4 = arith.constant 0 : index
    %3 = vector.load %arg4[%c0_3, %c0_4] : memref<1x384xf32, #tpu.memory_space<vmem>>, vector<1x384xf32>
    %4 = vector.broadcast %3 : vector<1x384xf32> to vector<16x384xf32>
    %5 = arith.addf %2, %4 : vector<16x384xf32>
    %6 = vector.extract_strided_slice %5 {offsets = [0, 0], sizes = [16, 128], strides = [1, 1]} : vector<16x384xf32> to vector<16x128xf32>
    %7 = arith.truncf %6 : vector<16x128xf32> to vector<16x128xbf16>
    %c0_5 = arith.constant 0 : index
    %c0_6 = arith.constant 0 : index
    %8 = vector.load %arg5[%c0_5, %c0_6] : memref<128x384xbf16, #tpu.memory_space<vmem>>, vector<128x128xbf16>
    %cst_7 = arith.constant dense<0.000000e+00> : vector<16x128xf32>
    %9 = tpu.matmul %7, %8, %cst_7 {dimension_numbers = #tpu.dot_dimension_numbers<[1], [0], [0], [1], [0, 0, 1, 1], [], []>} : vector<16x128xbf16>, vector<128x128xbf16>, vector<16x128xf32> -> vector<16x128xf32>
    %c0_8 = arith.constant 0 : index
    %c0_9 = arith.constant 0 : index
    %10 = vector.load %arg6[%c0_8, %c0_9] : memref<1x384xf32, #tpu.memory_space<vmem>>, vector<1x128xf32>
    %11 = vector.broadcast %10 : vector<1x128xf32> to vector<16x128xf32>
    %12 = arith.addf %9, %11 : vector<16x128xf32>
    %c0_10 = arith.constant 0 : index
    %c0_11 = arith.constant 0 : index
    %13 = vector.load %arg7[%c0_10, %c0_11] : memref<16x384xf32, #tpu.memory_space<vmem>>, vector<16x128xf32>
    tpu.vector_store %arg7[%c0_10, %c0_11], %12 {strides = array<i32>} : memref<16x384xf32, #tpu.memory_space<vmem>>, vector<16x128xf32>,
    %14 = tpu.iota {dimensions = array<i32: 1>} : vector<16x128xi32>
    %c8_i32 = arith.constant 8 : i32
    %15 = vector.broadcast %c8_i32 : i32 to vector<16x128xi32>
    %16 = arith.cmpi slt, %14, %15 : vector<16x128xi32>
    %cst_12 = arith.constant 0xFF800000 : f32
    %17 = vector.broadcast %cst_12 : f32 to vector<16x128xf32>
    %18 = arith.select %16, %12, %17 : vector<16x128xi1>, vector<16x128xf32>
    %cst_13 = arith.constant dense<0xFF800000> : vector<16xf32>
    %19 = vector.multi_reduction <maximumf>, %18, %cst_13 [1] : vector<16x128xf32> to vector<16xf32>
    %20 = vector.shape_cast %19 : vector<16xf32> to vector<16x1xf32>
    %21 = vector.broadcast %20 : vector<16x1xf32> to vector<16x128xf32>
    %22 = arith.cmpf oeq, %18, %21 : vector<16x128xf32>
    %23 = arith.andi %16, %22 : vector<16x128xi1>
    %c128_i32 = arith.constant 128 : i32
    %24 = vector.broadcast %c128_i32 : i32 to vector<16x128xi32>
    %25 = arith.select %23, %14, %24 : vector<16x128xi1>, vector<16x128xi32>
    %cst_14 = arith.constant dense<2147483647> : vector<16xi32>
    %26 = vector.multi_reduction <minsi>, %25, %cst_14 [1] : vector<16x128xi32> to vector<16xi32>
    %27 = vector.shape_cast %26 : vector<16xi32> to vector<16x1xi32>
    %28 = vector.broadcast %27 : vector<16x1xi32> to vector<16x128xi32>
    %29 = arith.cmpi eq, %14, %28 : vector<16x128xi32>
    %30 = arith.extui %29 : vector<16x128xi1> to vector<16x128xi32>
    %31 = arith.sitofp %30 : vector<16x128xi32> to vector<16x128xf32>
    %32 = arith.truncf %31 : vector<16x128xf32> to vector<16x128xbf16>
    %33 = vector.extract_strided_slice %5 {offsets = [0, 128], sizes = [16, 128], strides = [1, 1]} : vector<16x384xf32> to vector<16x128xf32>
    %c0_15 = arith.constant 0 : index
    %c0_16 = arith.constant 0 : index
    %34 = vector.load %arg3[%c0_15, %c0_16] : memref<256x128xbf16, #tpu.memory_space<vmem>>, vector<128x128xbf16>
    %cst_17 = arith.constant dense<0.000000e+00> : vector<16x128xf32>
    %35 = tpu.matmul %32, %34, %cst_17 {dimension_numbers = #tpu.dot_dimension_numbers<[1], [0], [0], [1], [0, 0, 1, 1], [], []>} : vector<16x128xbf16>, vector<128x128xbf16>, vector<16x128xf32> -> vector<16x128xf32>
    %36 = arith.addf %33, %35 : vector<16x128xf32>
    %37 = arith.truncf %36 : vector<16x128xf32> to vector<16x128xbf16>
    %c0_18 = arith.constant 0 : index
    %c128 = arith.constant 128 : index
    %38 = vector.load %arg5[%c0_18, %c128] : memref<128x384xbf16, #tpu.memory_space<vmem>>, vector<128x128xbf16>
    %cst_19 = arith.constant dense<0.000000e+00> : vector<16x128xf32>
    %39 = tpu.matmul %37, %38, %cst_19 {dimension_numbers = #tpu.dot_dimension_numbers<[1], [0], [0], [1], [0, 0, 1, 1], [], []>} : vector<16x128xbf16>, vector<128x128xbf16>, vector<16x128xf32> -> vector<16x128xf32>
    %c0_20 = arith.constant 0 : index
    %c128_21 = arith.constant 128 : index
    %40 = vector.load %arg6[%c0_20, %c128_21] : memref<1x384xf32, #tpu.memory_space<vmem>>, vector<1x128xf32>
    %41 = vector.broadcast %40 : vector<1x128xf32> to vector<16x128xf32>
    %42 = arith.addf %39, %41 : vector<16x128xf32>
    %c0_22 = arith.constant 0 : index
    %c128_23 = arith.constant 128 : index
    %43 = vector.load %arg7[%c0_22, %c128_23] : memref<16x384xf32, #tpu.memory_space<vmem>>, vector<16x128xf32>
    tpu.vector_store %arg7[%c0_22, %c128_23], %42 {strides = array<i32>} : memref<16x384xf32, #tpu.memory_space<vmem>>, vector<16x128xf32>,
    %44 = tpu.iota {dimensions = array<i32: 1>} : vector<16x128xi32>
    %c12_i32 = arith.constant 12 : i32
    %45 = vector.broadcast %c12_i32 : i32 to vector<16x128xi32>
    %46 = arith.cmpi slt, %44, %45 : vector<16x128xi32>
    %cst_24 = arith.constant 0xFF800000 : f32
    %47 = vector.broadcast %cst_24 : f32 to vector<16x128xf32>
    %48 = arith.select %46, %42, %47 : vector<16x128xi1>, vector<16x128xf32>
    %cst_25 = arith.constant dense<0xFF800000> : vector<16xf32>
    %49 = vector.multi_reduction <maximumf>, %48, %cst_25 [1] : vector<16x128xf32> to vector<16xf32>
    %50 = vector.shape_cast %49 : vector<16xf32> to vector<16x1xf32>
    %51 = vector.broadcast %50 : vector<16x1xf32> to vector<16x128xf32>
    %52 = arith.cmpf oeq, %48, %51 : vector<16x128xf32>
    %53 = arith.andi %46, %52 : vector<16x128xi1>
    %c128_i32_26 = arith.constant 128 : i32
    %54 = vector.broadcast %c128_i32_26 : i32 to vector<16x128xi32>
    %55 = arith.select %53, %44, %54 : vector<16x128xi1>, vector<16x128xi32>
    %cst_27 = arith.constant dense<2147483647> : vector<16xi32>
    %56 = vector.multi_reduction <minsi>, %55, %cst_27 [1] : vector<16x128xi32> to vector<16xi32>
    %57 = vector.shape_cast %56 : vector<16xi32> to vector<16x1xi32>
    %58 = vector.broadcast %57 : vector<16x1xi32> to vector<16x128xi32>
    %59 = arith.cmpi eq, %44, %58 : vector<16x128xi32>
    %60 = arith.extui %59 : vector<16x128xi1> to vector<16x128xi32>
    %61 = arith.sitofp %60 : vector<16x128xi32> to vector<16x128xf32>
    %62 = arith.truncf %61 : vector<16x128xf32> to vector<16x128xbf16>
    %63 = vector.extract_strided_slice %5 {offsets = [0, 256], sizes = [16, 128], strides = [1, 1]} : vector<16x384xf32> to vector<16x128xf32>
    %c128_28 = arith.constant 128 : index
    %c0_29 = arith.constant 0 : index
    %64 = vector.load %arg3[%c128_28, %c0_29] : memref<256x128xbf16, #tpu.memory_space<vmem>>, vector<128x128xbf16>
    %cst_30 = arith.constant dense<0.000000e+00> : vector<16x128xf32>
    %65 = tpu.matmul %62, %64, %cst_30 {dimension_numbers = #tpu.dot_dimension_numbers<[1], [0], [0], [1], [0, 0, 1, 1], [], []>} : vector<16x128xbf16>, vector<128x128xbf16>, vector<16x128xf32> -> vector<16x128xf32>
    %66 = arith.addf %63, %65 : vector<16x128xf32>
    %67 = arith.truncf %66 : vector<16x128xf32> to vector<16x128xbf16>
    %c0_31 = arith.constant 0 : index
    %c256 = arith.constant 256 : index
    %68 = vector.load %arg5[%c0_31, %c256] : memref<128x384xbf16, #tpu.memory_space<vmem>>, vector<128x128xbf16>
    %cst_32 = arith.constant dense<0.000000e+00> : vector<16x128xf32>
    %69 = tpu.matmul %67, %68, %cst_32 {dimension_numbers = #tpu.dot_dimension_numbers<[1], [0], [0], [1], [0, 0, 1, 1], [], []>} : vector<16x128xbf16>, vector<128x128xbf16>, vector<16x128xf32> -> vector<16x128xf32>
    %c0_33 = arith.constant 0 : index
    %c256_34 = arith.constant 256 : index
    %70 = vector.load %arg6[%c0_33, %c256_34] : memref<1x384xf32, #tpu.memory_space<vmem>>, vector<1x128xf32>
    %71 = vector.broadcast %70 : vector<1x128xf32> to vector<16x128xf32>
    %72 = arith.addf %69, %71 : vector<16x128xf32>
    %c0_35 = arith.constant 0 : index
    %c256_36 = arith.constant 256 : index
    %73 = vector.load %arg7[%c0_35, %c256_36] : memref<16x384xf32, #tpu.memory_space<vmem>>, vector<16x128xf32>
    tpu.vector_store %arg7[%c0_35, %c256_36], %72 {strides = array<i32>} : memref<16x384xf32, #tpu.memory_space<vmem>>, vector<16x128xf32>,
    return
  }
  func.func @transform_0(%arg0: i32) -> (i32, i32) {
    %c0_i32 = arith.constant 0 : i32
    %c0_i32_0 = arith.constant 0 : i32
    return %arg0, %c0_i32 : i32, i32
  }
  func.func @transform_1(%arg0: i32) -> (i32, i32) {
    %c0_i32 = arith.constant 0 : i32
    %c0_i32_0 = arith.constant 0 : i32
    %c0_i32_1 = arith.constant 0 : i32
    return %c0_i32, %c0_i32_0 : i32, i32
  }
  func.func @transform_2(%arg0: i32) -> (i32, i32) {
    %c0_i32 = arith.constant 0 : i32
    %c0_i32_0 = arith.constant 0 : i32
    %c0_i32_1 = arith.constant 0 : i32
    return %c0_i32, %c0_i32_0 : i32, i32
  }
  func.func @transform_3(%arg0: i32) -> (i32, i32) {
    %c0_i32 = arith.constant 0 : i32
    %c0_i32_0 = arith.constant 0 : i32
    %c0_i32_1 = arith.constant 0 : i32
    return %c0_i32, %c0_i32_0 : i32, i32
  }
  func.func @transform_4(%arg0: i32) -> (i32, i32) {
    %c0_i32 = arith.constant 0 : i32
    %c0_i32_0 = arith.constant 0 : i32
    %c0_i32_1 = arith.constant 0 : i32
    return %c0_i32, %c0_i32_0 : i32, i32
  }
  func.func @transform_5(%arg0: i32) -> (i32, i32) {
    %c0_i32 = arith.constant 0 : i32
    %c0_i32_0 = arith.constant 0 : i32
    %c0_i32_1 = arith.constant 0 : i32
    return %c0_i32, %c0_i32_0 : i32, i32
  }
  func.func @transform_6(%arg0: i32) -> (i32, i32) {
    %c0_i32 = arith.constant 0 : i32
    %c0_i32_0 = arith.constant 0 : i32
    return %arg0, %c0_i32 : i32, i32
  }
}

</mosaic_0001>

<bundles_post_ra>
// kernel: tpu_custom_call.1
= control target key start
LH: loop header
LB: loop body
LE: loop exit
PB: predicated region body
PF: predicated region fallthrough
CT: control target
= control target key end

     0   :  { %11 = vsyncpa [#allocation3], 0  ;;  %s1732_s0 = inlined_call_operand.hbm [shape: bf16[16,128], index: 0, kind: input, shape index: {}]   ;;  %s1733_s1 = inlined_call_operand.hbm [shape: bf16[128,384], index: 1, kind: input, shape index: {}]   ;;  %s1734_s2 = inlined_call_operand.hbm [shape: bf16[256,128], index: 2, kind: input, shape index: {}]   ;;  %s1735_s3 = inlined_call_operand.vmem [shape: f32[1,384], index: 3, kind: input, shape index: {}]   ;;  %s1736_s4 = inlined_call_operand.hbm [shape: bf16[128,384], index: 4, kind: input, shape index: {}]   ;;  %s1737_s5 = inlined_call_operand.vmem [shape: f32[1,384], index: 5, kind: input, shape index: {}]   ;;  %s1738_s6 = inlined_call_operand.hbm [shape: f32[16,384], index: 6, kind: output, shape index: {}]  }
   0x1   :  { %12 = vsyncpa [#allocation6], 0 }
   0x2   :  { %13 = vsyncpa [#allocation9], 0 }
   0x3   :  { %14 = vsyncpa [#allocation4], 0  ;;  %s1487_s21 = smov [#allocation5]   ;;  %s1369_s25 = scalar_lea.hbm %s1733_s1, 3072 }
   0x4   :  { %s32_s22 = sshll.u32 %s1487_s21, 4  ;;  %p1370_p0 = scmp.ne.s32.totalorder %s1733_s1, %s1369_s25  ;;  %s33_s22 = int_to_ptr.vmem [resolvable:$true] %s32_s22 }
   0x5   :  { %p1373_p1 = scmp.lt.u32.totalorder %s1369_s25, %s1733_s1 }
   0x7   :  { %p1375_p2 = pnand %p1373_p1, %p1370_p0 }
   0x9   :  { %1378 = shalt.err (!%p1375_p2)
}
   0xa   :  { %s1379_s30 = scalar_lea.vmem %s33_s22, 3072  ;;  %p1384_p4 = scmp.lt.s32.totalorder %s33_s22, %s33_s22 }
   0xb   :  { %p1380_p3 = scmp.ne.s32.totalorder %s33_s22, %s1379_s30  ;;  %p1385_p5 = scmp.lt.s32.totalorder %s1379_s30, %s1379_s30 }
   0xd   :  { %p1386_p6 = por %p1385_p5, %p1384_p4 }
   0xf   :  { %p1387_p7 = pnand %p1386_p6, %p1380_p3 }
  0x11   :  { %1390 = shalt.err (!%p1387_p7)
}
  0x12   :  { %s1488_s7 = smov 192   ;;  %s1489_s8 = smov 12  }
  0x13   :  { %38 = dma.hbm_to_vmem [thread:$0]  %s1733_s1, 3072, %s33_s22, [#allocation6], %s1488_s7, %s1488_s7, %s1489_s8  }
  0x14   :  { %s1490_s11 = smov [#allocation2]   ;;  %s1391_s15 = scalar_lea.hbm %s1732_s0, 128 }
  0x15   :  { %s20_s12 = sshll.u32 %s1490_s11, 4  ;;  %p1392_p8 = scmp.ne.s32.totalorder %s1732_s0, %s1391_s15  ;;  %s21_s12 = int_to_ptr.vmem [resolvable:$true] %s20_s12 }
  0x16   :  { %p1395_p9 = scmp.lt.u32.totalorder %s1391_s15, %s1732_s0 }
  0x18   :  { %p1397_p10 = pnand %p1395_p9, %p1392_p8 }
  0x1a   :  { %1400 = shalt.err (!%p1397_p10)
}
  0x1b   :  { %s1401_s20 = scalar_lea.vmem %s21_s12, 128  ;;  %p1406_p12 = scmp.lt.s32.totalorder %s21_s12, %s21_s12 }
  0x1c   :  { %p1402_p11 = scmp.ne.s32.totalorder %s21_s12, %s1401_s20  ;;  %p1407_p13 = scmp.lt.s32.totalorder %s1401_s20, %s1401_s20 }
  0x1e   :  { %p1408_p0 = por %p1407_p13, %p1406_p12 }
  0x20   :  { %p1409_p1 = pnand %p1408_p0, %p1402_p11 }
  0x22   :  { %1412 = shalt.err (!%p1409_p1)
}
  0x23   :  { %s1491_s1 = smov 64   ;;  %s1492_s21 = smov 4  }
  0x24   :  { %26 = dma.hbm_to_vmem [thread:$0]  %s1732_s0, 128, %s21_s12, [#allocation3], %s1491_s1, %s1491_s1, %s1492_s21  }
  0x25   :  { %s1493_s24 = smov [#allocation7]   ;;  %s1494_s26 = smov [#allocation8]  }
  0x26   :  { %s44_s25 = sshll.u32 %s1493_s24, 4  ;;  %s58_s27 = sshll.u32 %s1494_s26, 4  ;;  %s45_s25 = int_to_ptr.vmem [resolvable:$true] %s44_s25  ;;  %s1564_s27 = int_to_ptr.vmem [resolvable:$true] %s58_s27 }
  0x27   :  { %s1413_s30 = scalar_lea.hbm %s1734_s2, 2048 }
  0x28   :  { %p1414_p2 = scmp.ne.s32.totalorder %s1734_s2, %s1413_s30  ;;  %p1417_p3 = scmp.lt.u32.totalorder %s1413_s30, %s1734_s2 }
  0x2a   :  { %p1419_p4 = pnand %p1417_p3, %p1414_p2 }
  0x2c   :  { %1422 = shalt.err (!%p1419_p4)
}
  0x2d   :  { %s1423_s0 = scalar_lea.vmem %s45_s25, 2048  ;;  %p1428_p6 = scmp.lt.s32.totalorder %s45_s25, %s45_s25 }
  0x2e   :  { %p1424_p5 = scmp.ne.s32.totalorder %s45_s25, %s1423_s0  ;;  %p1429_p7 = scmp.lt.s32.totalorder %s1423_s0, %s1423_s0 }
  0x30   :  { %p1430_p8 = por %p1429_p7, %p1428_p6 }
  0x32   :  { %p1431_p9 = pnand %p1430_p8, %p1424_p5 }
  0x34   :  { %1434 = shalt.err (!%p1431_p9)
}
  0x35   :  { %50 = dma.hbm_to_vmem [thread:$0]  %s1734_s2, 2048, %s45_s25, [#allocation6], %s1491_s1, %s1491_s1, %s1492_s21  }
  0x36   :  { %s1435_s17 = scalar_lea.hbm %s1736_s4, 3072 }
  0x37   :  { %p1436_p10 = scmp.ne.s32.totalorder %s1736_s4, %s1435_s17  ;;  %p1439_p11 = scmp.lt.u32.totalorder %s1435_s17, %s1736_s4 }
  0x39   :  { %p1441_p12 = pnand %p1439_p11, %p1436_p10 }
  0x3b   :  { %1444 = shalt.err (!%p1441_p12)
}
  0x3c   :  { %s1445_s23 = scalar_lea.vmem %s1564_s27, 3072  ;;  %p1450_p0 = scmp.lt.s32.totalorder %s1564_s27, %s1564_s27 }
  0x3d   :  { %p1446_p13 = scmp.ne.s32.totalorder %s1564_s27, %s1445_s23  ;;  %p1451_p1 = scmp.lt.s32.totalorder %s1445_s23, %s1445_s23 }
  0x3f   :  { %p1452_p2 = por %p1451_p1, %p1450_p0 }
  0x41   :  { %p1453_p3 = pnand %p1452_p2, %p1446_p13 }
  0x43   :  { %1456 = shalt.err (!%p1453_p3)
}
  0x44   :  { %64 = dma.hbm_to_vmem [thread:$0]  %s1736_s4, 3072, %s1564_s27, [#allocation9], %s1488_s7, %s1488_s7, %s1489_s8  }
  0x45   :  { %1479 = dma.done.wait [#allocation3], 128  }
  0x46   :  { %1480 = vsyncadd [#allocation3], 4294967168 }
  0x47   :  { %1481 = dma.done.wait [#allocation6], 5120  }
  0x48   :  { %1482 = vsyncadd [#allocation6], 4294962176 }
  0x49   :  { %1483 = dma.done.wait [#allocation9], 3072  }
  0x4a   :  { %1484 = vsyncadd [#allocation9], 4294964224  ;;  %v1495_v0 = vmov 0   ;;  %v1496_v1 = vmov 0.0   ;;  %v1296_v2 = vld [vmem:[#allocation5 + $0x4] ss:$12 sps:$4 sm:$0xff]   ;;  %v116_v27 = vlaneseq }
  0x4b   :  { %297 = vmatprep.mubr.bf16.mxu0 %v1495_v0  ;;  %1155 = vmatprep.subr.bf16.mxu1 %v1496_v1  ;;  %v1298_v3 = vld [vmem:[#allocation5] ss:$12 sps:$4 sm:$0xff]   ;;  %v1299_v4 = vld [vmem:[#allocation5 + $0x1c] ss:$12 sps:$4 sm:$0xff]   ;;  %v1301_v5 = vld [vmem:[#allocation5 + $0x18] ss:$12 sps:$4 sm:$0xff]  }
  0x4c   :  { %265 = vmatprep.subr.bf16.mxu0 %v1296_v2  ;;  %v1302_v6 = vld [vmem:[#allocation5 + $0x34] ss:$12 sps:$4 sm:$0xff]   ;;  %v1304_v7 = vld [vmem:[#allocation5 + $0x30] ss:$12 sps:$4 sm:$0xff]   ;;  %v1305_v8 = vld [vmem:[#allocation5 + $0x4c] ss:$12 sps:$4 sm:$0xff]  }
  0x4d   :  { %266 = vmatpush1.bf16.msra.mxu0 %v1298_v3  ;;  %v1307_v9 = vld [vmem:[#allocation5 + $0x48] ss:$12 sps:$4 sm:$0xff]   ;;  %v1308_v10 = vld [vmem:[#allocation5 + $0x64] ss:$12 sps:$4 sm:$0xff]   ;;  %v1310_v11 = vld [vmem:[#allocation5 + $0x60] ss:$12 sps:$4 sm:$0xff]  }
  0x4e   :  { %267 = vmatprep.subr.bf16.mxu0 %v1299_v4  ;;  %v1311_v12 = vld [vmem:[#allocation5 + $0x7c] ss:$12 sps:$4 sm:$0xff]   ;;  %v1313_v13 = vld [vmem:[#allocation5 + $0x78] ss:$12 sps:$4 sm:$0xff]   ;;  %v1314_v14 = vld [vmem:[#allocation5 + $0x94] ss:$12 sps:$4 sm:$0xff]  }
  0x4f   :  { %v1316_v15 = vld [vmem:[#allocation5 + $0x90] ss:$12 sps:$4 sm:$0xff]   ;;  %v1317_v16 = vld [vmem:[#allocation5 + $0xac] ss:$12 sps:$4 sm:$0xff]   ;;  %v1319_v17 = vld [vmem:[#allocation5 + $0xa8] ss:$12 sps:$4 sm:$0xff]  }
  0x50   :  { %v1599_v18 = vld [vmem:[#allocation2] sm:$0xff]   ;;  %v1321_v19 = vld [vmem:[#allocation8] ss:$12 sps:$4 sm:$0xff]   ;;  %v1324_v22 = vld [vmem:[#allocation8 + $0x48] ss:$12 sps:$4 sm:$0xff]   ;;  %vm1497_vm0 = vmmov 0  }
  0x51   :  { %268 = vmatpush1.bf16.msra.mxu0 %v1301_v5  ;;  %v1322_v20 = vld [vmem:[#allocation8 + $0x18] ss:$12 sps:$4 sm:$0xff]   ;;  %v1323_v21 = vld [vmem:[#allocation8 + $0x30] ss:$12 sps:$4 sm:$0xff]   ;;  %v1325_v23 = vld [vmem:[#allocation8 + $0x60] ss:$12 sps:$4 sm:$0xff]   ;;  %1171 = vmatprep.mubr.msk.bf16.mxu1 %vm1497_vm0, %v1496_v1 }
  0x52   :  { %269 = vmatprep.subr.bf16.mxu0 %v1302_v6  ;;  %v1326_v24 = vld [vmem:[#allocation8 + $0x78] ss:$12 sps:$4 sm:$0xff]   ;;  %v1327_v25 = vld [vmem:[#allocation8 + $0x90] ss:$12 sps:$4 sm:$0xff]   ;;  %v1328_v26 = vld [vmem:[#allocation8 + $0xa8] ss:$12 sps:$4 sm:$0xff]  }
  0x53   :  { %v1615_v28 = vshrl.u32 %v116_v27, 7  ;;  %v1621_v30 = vld [vmem:[%s1735_s3] sm:$0x7]  ;;  %v1630_v39 = vand.u32 127, %v116_v27  ;;  %v1329_v57 = vld [vmem:[#allocation5 + $0x8] ss:$12 sps:$4 sm:$0xff]  }
  0x54   :  { %v1050_v40 = vld [vmem:[%s1737_s5] ss:$0 sm:$0xff]  ;;  %1156 = vmatpush3.bf16.msra.mxu1 %v1329_v57  ;;  %v1330_v58 = vld [vmem:[#allocation5 + $0x20] ss:$12 sps:$4 sm:$0xff]   ;;  %v1332_v60 = vld [vmem:[#allocation5 + $0x50] ss:$12 sps:$4 sm:$0xff]  }
  0x55   :  { %270 = vmatpush1.bf16.msra.mxu0 %v1304_v7  ;;  %v118_v29 = vsub.s32 0, %v1615_v28  ;;  %vm466_vm1 = vcmp.lt.s32.totalorder %v1630_v39, 8  ;;  %1157 = vmatprep.subr.bf16.mxu1 %v1496_v1  ;;  %v1331_v59 = vld [vmem:[#allocation5 + $0x38] ss:$12 sps:$4 sm:$0xff]   ;;  %v1333_v61 = vld [vmem:[#allocation5 + $0x68] ss:$12 sps:$4 sm:$0xff]  }
  0x56   :  { %271 = vmatprep.subr.bf16.mxu0 %v1305_v8  ;;  %v1334_v62 = vld [vmem:[#allocation5 + $0x80] ss:$12 sps:$4 sm:$0xff]   ;;  %v1335_v63 = vld [vmem:[#allocation5 + $0x98] ss:$12 sps:$4 sm:$0xff]   ;;  %v1336_v0 = vld [vmem:[#allocation5 + $0xb0] ss:$12 sps:$4 sm:$0xff]  }
  0x57   :  { %v119_v31 = vrot.slane %v1621_v30, %v118_v29  ;;  %v1337_v2 = vld [vmem:[#allocation7] sm:$0xff]   ;;  %v1338_v3 = vld [vmem:[#allocation7 + $0x8] sm:$0xff]   ;;  %v1339_v4 = vld [vmem:[#allocation7 + $0x10] sm:$0xff]   ;;  %vm736_vm11 = vcmp.lt.s32.totalorder %v1630_v39, 12  ;;  %s1499_s27 = smov [#allocation10]  }
  0x58   :  { %1158 = vmatpush3.bf16.msra.mxu1 %v1330_v58  ;;  %v1340_v5 = vld [vmem:[#allocation7 + $0x18] sm:$0xff]   ;;  %v1341_v6 = vld [vmem:[#allocation7 + $0x20] sm:$0xff]   ;;  %v1342_v7 = vld [vmem:[#allocation7 + $0x28] sm:$0xff]   ;;  %s1011_s28 = sshll.u32 %s1499_s27, 4  ;;  %s1012_s28 = int_to_ptr.vmem [resolvable:$true] %s1011_s28 }
  0x59   :  { %272 = vmatpush1.bf16.msra.mxu0 %v1307_v9  ;;  %1159 = vmatprep.subr.bf16.mxu1 %v1496_v1  ;;  %s1457_s29 = scalar_lea.vmem %s1012_s28, 768  ;;  %p1462_p5 = scmp.lt.s32.totalorder %s1012_s28, %s1012_s28 }
  0x5a   :  { %273 = vmatprep.subr.bf16.mxu0 %v1308_v10  ;;  %p1458_p4 = scmp.ne.s32.totalorder %s1012_s28, %s1457_s29  ;;  %p1463_p6 = scmp.lt.s32.totalorder %s1457_s29, %s1457_s29 }
  0x5c   :  { %1160 = vmatpush3.bf16.msra.mxu1 %v1331_v59  ;;  %p1464_p7 = por %p1463_p6, %p1462_p5 }
  0x5d   :  { %274 = vmatpush1.bf16.msra.mxu0 %v1310_v11  ;;  %1161 = vmatprep.subr.bf16.mxu1 %v1496_v1 }
  0x5e   :  { %275 = vmatprep.subr.bf16.mxu0 %v1311_v12  ;;  %p1465_p8 = pnand %p1464_p7, %p1458_p4 }
  0x60   :  { %1162 = vmatpush3.bf16.msra.mxu1 %v1332_v60 }
  0x61   :  { %276 = vmatpush1.bf16.msra.mxu0 %v1313_v13  ;;  %1163 = vmatprep.subr.bf16.mxu1 %v1496_v1 }
  0x62   :  { %277 = vmatprep.subr.bf16.mxu0 %v1314_v14 }
  0x64   :  { %1164 = vmatpush3.bf16.msra.mxu1 %v1333_v61 }
  0x65   :  { %278 = vmatpush1.bf16.msra.mxu0 %v1316_v15  ;;  %1165 = vmatprep.subr.bf16.mxu1 %v1496_v1 }
  0x66   :  { %279 = vmatprep.subr.bf16.mxu0 %v1317_v16  ;;  %v1343_v16 = vld [vmem:[#allocation7 + $0x30] sm:$0xff]  }
  0x68   :  { %1166 = vmatpush3.bf16.msra.mxu1 %v1334_v62 }
  0x69   :  { %280 = vmatpush1.bf16.msra.mxu0 %v1319_v17  ;;  %1167 = vmatprep.subr.bf16.mxu1 %v1496_v1  ;;  %v1344_v17 = vld [vmem:[#allocation7 + $0x38] sm:$0xff]  }
  0x6a   :  { %1175 = vmatprep.subr.bf16.mxu0 %v1496_v1 }
  0x6c   :  { %298 = vmatmul.mubr.bf16.vlgmr.msra.gmra.mrb[0].mxu0 %v1599_v18  ;;  %1168 = vmatpush3.bf16.msra.mxu1 %v1335_v63 }
  0x6d   :  { %1176 = vmatpush3.bf16.msra.mxu0 %v1321_v19  ;;  %1191 = vmatprep.mubr.msk.bf16.mxu0 %vm1497_vm0, %v1496_v1  ;;  %v1346_v19 = vld [vmem:[#allocation8 + $0x1c] ss:$12 sps:$4 sm:$0xff]  }
  0x6e   :  { %1177 = vmatprep.subr.bf16.mxu0 %v1496_v1  ;;  %1169 = vmatprep.subr.bf16.mxu1 %v1496_v1 }
  0x70   :  { %1170 = vmatpush3.bf16.msra.mxu1 %v1336_v0 }
  0x71   :  { %1178 = vmatpush3.bf16.msra.mxu0 %v1322_v20  ;;  %1195 = vmatprep.subr.bf16.mxu1 %v1496_v1  ;;  %v1347_v20 = vld [vmem:[#allocation8 + $0x34] ss:$12 sps:$4 sm:$0xff]  }
  0x72   :  { %1179 = vmatprep.subr.bf16.mxu0 %v1496_v1 }
  0x73   :  { %1172 = vmatmul.mubr.bf16.vlgmr.msra.gmra.mrb[0].mxu1 %v1599_v18  ;;  %v1345_v18 = vld [vmem:[#allocation8 + $0x4] ss:$12 sps:$4 sm:$0xff]  }
  0x74   :  { %1196 = vmatpush3.bf16.msra.mxu1 %v1337_v2  ;;  %1211 = vmatprep.mubr.msk.bf16.mxu1 %vm1497_vm0, %v1496_v1 }
  0x75   :  { %1180 = vmatpush3.bf16.msra.mxu0 %v1323_v21  ;;  %1197 = vmatprep.subr.bf16.mxu1 %v1496_v1  ;;  %v1348_v21 = vld [vmem:[#allocation8 + $0x4c] ss:$12 sps:$4 sm:$0xff]  }
  0x76   :  { %1181 = vmatprep.subr.bf16.mxu0 %v1496_v1 }
  0x78   :  { %1198 = vmatpush3.bf16.msra.mxu1 %v1338_v3 }
  0x79   :  { %1182 = vmatpush3.bf16.msra.mxu0 %v1324_v22  ;;  %1199 = vmatprep.subr.bf16.mxu1 %v1496_v1  ;;  %v1349_v22 = vld [vmem:[#allocation8 + $0x64] ss:$12 sps:$4 sm:$0xff]  }
  0x7a   :  { %1183 = vmatprep.subr.bf16.mxu0 %v1496_v1 }
  0x7c   :  { %1200 = vmatpush3.bf16.msra.mxu1 %v1339_v4 }
  0x7d   :  { %1184 = vmatpush3.bf16.msra.mxu0 %v1325_v23  ;;  %1201 = vmatprep.subr.bf16.mxu1 %v1496_v1  ;;  %v1350_v23 = vld [vmem:[#allocation8 + $0x7c] ss:$12 sps:$4 sm:$0xff]  }
  0x7e   :  { %1185 = vmatprep.subr.bf16.mxu0 %v1496_v1 }
  0x80   :  { %1202 = vmatpush3.bf16.msra.mxu1 %v1340_v5  ;;  %v1353_v5 = vld [vmem:[#allocation7 + $0x40] sm:$0xff]  }
  0x81   :  { %1186 = vmatpush3.bf16.msra.mxu0 %v1326_v24  ;;  %1203 = vmatprep.subr.bf16.mxu1 %v1496_v1 }
  0x82   :  { %1187 = vmatprep.subr.bf16.mxu0 %v1496_v1 }
  0x84   :  { %1204 = vmatpush3.bf16.msra.mxu1 %v1341_v6  ;;  %v1354_v6 = vld [vmem:[#allocation7 + $0x48] sm:$0xff]  }
  0x85   :  { %1188 = vmatpush3.bf16.msra.mxu0 %v1327_v25  ;;  %1205 = vmatprep.subr.bf16.mxu1 %v1496_v1 }
  0x86   :  { %1189 = vmatprep.subr.bf16.mxu0 %v1496_v1 }
  0x88   :  { %1206 = vmatpush3.bf16.msra.mxu1 %v1342_v7  ;;  %v1355_v7 = vld [vmem:[#allocation7 + $0x50] sm:$0xff]  }
  0x89   :  { %1190 = vmatpush3.bf16.msra.mxu0 %v1328_v26  ;;  %1207 = vmatprep.subr.bf16.mxu1 %v1496_v1 }
  0x8a   :  { %1215 = vmatprep.subr.bf16.mxu0 %v1496_v1 }
  0x8c   :  { %1208 = vmatpush3.bf16.msra.mxu1 %v1343_v16 }
  0x8d   :  { %1209 = vmatprep.subr.bf16.mxu1 %v1496_v1 }
  0x90   :  { %1210 = vmatpush3.bf16.msra.mxu1 %v1344_v17 }
  0x91   :  { %1235 = vmatprep.subr.bf16.mxu1 %v1496_v1 }
 0x13f   :  { %v299_v32 = vpop.f32.mrb[0].mxu0 }
 0x140   :  { %v1624_v33 = vpop.f32.mrb[1].mxu0  ;;  %v300_v35 = vadd.f32 %v299_v32, %v119_v31 }
 0x141   :  { %v303_v34 = vpop.f32.mrb[2].mxu0 }
 0x142   :  { %v304_v36 = vadd.f32 %v303_v34, %v119_v31  ;;  %v1626_v37 = vpop.f32.mrb[3].mxu0 }
 0x144   :  { %v349_v38 = vpack.c.bf16 %v304_v36, %v300_v35 }
 0x146   :  { %1192 = vmatmul.mubr.bf16.vlgmr.msra.gmra.mrb[4].mxu0 %v349_v38  ;;  %v1498_v38 = vmov 1.0|1.0  }
 0x147   :  { %1231 = vmatprep.mubr.msk.bf16.mxu0 %vm1497_vm0, %v1496_v1  ;;  %1216 = vmatpush3.bf16.msra.mxu0 %v1345_v18 }
 0x148   :  { %1217 = vmatprep.subr.bf16.mxu0 %v1496_v1 }
 0x14b   :  { %1218 = vmatpush3.bf16.msra.mxu0 %v1346_v19  ;;  %v1359_v19 = vld [vmem:[#allocation7 + $0x70] sm:$0xff]  }
 0x14c   :  { %1219 = vmatprep.subr.bf16.mxu0 %v1496_v1 }
 0x14f   :  { %1220 = vmatpush3.bf16.msra.mxu0 %v1347_v20  ;;  %v1360_v20 = vld [vmem:[#allocation7 + $0x78] sm:$0xff]  }
 0x150   :  { %1221 = vmatprep.subr.bf16.mxu0 %v1496_v1 }
 0x153   :  { %1222 = vmatpush3.bf16.msra.mxu0 %v1348_v21  ;;  %v1361_v21 = vld [vmem:[#allocation8 + $0x8] ss:$12 sps:$4 sm:$0xff]  }
 0x154   :  { %1223 = vmatprep.subr.bf16.mxu0 %v1496_v1 }
 0x157   :  { %1224 = vmatpush3.bf16.msra.mxu0 %v1349_v22  ;;  %v1362_v22 = vld [vmem:[#allocation8 + $0x20] ss:$12 sps:$4 sm:$0xff]  }
 0x158   :  { %1225 = vmatprep.subr.bf16.mxu0 %v1496_v1 }
 0x15b   :  { %1226 = vmatpush3.bf16.msra.mxu0 %v1350_v23  ;;  %v1363_v23 = vld [vmem:[#allocation8 + $0x38] ss:$12 sps:$4 sm:$0xff]  }
 0x15c   :  { %1227 = vmatprep.subr.bf16.mxu0 %v1496_v1 }
 0x219   :  { %v455_v41 = vpop.f32.mrb[4].mxu0 }
 0x21a   :  { %v456_v42 = vadd.f32 %v1050_v40, %v455_v41  ;;  %v1193_v43 = vpop.f32.mrb[5].mxu0  ;;  %v1352_v41 = vld [vmem:[#allocation8 + $0xac] ss:$12 sps:$4 sm:$0xff]  }
 0x21b   :  { %v458_v44 = vpop.f32.mrb[6].mxu0 }
 0x21c   :  { %462 = vst [vmem:[#allocation10] sm:$0xff] %v456_v42  ;;  %v459_v45 = vadd.f32 %v1050_v40, %v458_v44  ;;  %v1194_v46 = vpop.f32.mrb[7].mxu0  ;;  %v467_v47 = vsel %vm466_vm1, %v456_v42, -inf  ;;  %v1351_v40 = vld [vmem:[#allocation8 + $0x94] ss:$12 sps:$4 sm:$0xff]   ;;  %v122_v42 = vsub.s32 1, %v1615_v28 }
 0x21d   :  { %469 = vmax.xlane.f32.xlu0 %v467_v47  ;;  %1228 = vmatpush3.bf16.msra.mxu0 %v1351_v40 }
 0x21e   :  { %463 = vst [vmem:[#allocation10 + $0x18] sm:$0xff] %v459_v45  ;;  %v468_v48 = vsel %vm466_vm1, %v459_v45, -inf  ;;  %1229 = vmatprep.subr.bf16.mxu0 %v1496_v1  ;;  %v123_v43 = vrot.slane %v1621_v30, %v122_v42 }
 0x220   :  { %v302_v44 = vadd.f32 %v1624_v33, %v123_v43  ;;  %v306_v46 = vadd.f32 %v1626_v37, %v123_v43  ;;  %v1367_v43 = vld [vmem:[#allocation8 + $0x98] ss:$12 sps:$4 sm:$0xff]  }
 0x221   :  { %471 = vmax.xlane.f32.xlu0 %v468_v48  ;;  %1230 = vmatpush3.bf16.msra.mxu0 %v1352_v41 }
 0x222   :  { %1255 = vmatprep.subr.bf16.mxu0 %v1496_v1 }
 0x2aa   :  { %v470_v49 = vpop.xlane.xlu0 %469 }
 0x2ab   :  { %vm473_vm2 = vcmp.eq.f32.partialorder %v467_v47, %v470_v49 }
 0x2ac   :  { %vm475_vm3 = vmand %vm466_vm1, %vm473_vm2 }
 0x2ad   :  { %v477_v50 = vsel %vm475_vm3, %v1630_v39, 128 }
 0x2ae   :  { %v472_v51 = vpop.xlane.xlu0 %471  ;;  %v480_v52 = vshra.s32 %v477_v50, 16  ;;  %v479_v8 = vand.u32 65535, %v477_v50 }
 0x2af   :  { %vm474_vm4 = vcmp.eq.f32.partialorder %v468_v48, %v472_v51 }
 0x2b0   :  { %vm476_vm5 = vmand %vm466_vm1, %vm474_vm4  ;;  %v482_v53 = vcvt.s32.f32 %v480_v52  ;;  %v481_v10 = vcvt.s32.f32 %v479_v8  ;;  %v1356_v8 = vld [vmem:[#allocation7 + $0x58] sm:$0xff]  }
 0x2b1   :  { %v478_v54 = vsel %vm476_vm5, %v1630_v39, 128 }
 0x2b2   :  { %483 = vmin.xlane.f32.xlu1 %v482_v53  ;;  %v494_v55 = vshra.s32 %v478_v54, 16  ;;  %v493_v11 = vand.u32 65535, %v478_v54 }
 0x2b4   :  { %v496_v56 = vcvt.s32.f32 %v494_v55  ;;  %v495_v14 = vcvt.s32.f32 %v493_v11 }
 0x2b6   :  { %497 = vmin.xlane.f32.xlu1 %v496_v56 }
 0x33f   :  { %v484_v9 = vpop.xlane.xlu1 %483 }
 0x340   :  { %vm485_vm6 = vcmp.eq.f32.partialorder %v482_v53, %v484_v9  ;;  %v490_v24 = vcvt.f32.s32 %v484_v9  ;;  %v1071_v53 = vld [vmem:[%s1737_s5 + $0x1] ss:$0 sm:$0xff]  ;;  %v1357_v9 = vld [vmem:[#allocation7 + $0x60] sm:$0xff]  }
 0x341   :  { %v486_v12 = vsel %vm485_vm6, %v481_v10, inf  ;;  %v1358_v10 = vld [vmem:[#allocation7 + $0x68] sm:$0xff]  }
 0x342   :  { %487 = vmin.xlane.f32.xlu0 %v486_v12  ;;  %v491_v29 = vshll.u32 %v490_v24, 16  ;;  %v1364_v24 = vld [vmem:[#allocation8 + $0x50] ss:$12 sps:$4 sm:$0xff]  }
 0x343   :  { %v498_v13 = vpop.xlane.xlu1 %497 }
 0x344   :  { %vm499_vm7 = vcmp.eq.f32.partialorder %v496_v56, %v498_v13  ;;  %v504_v26 = vcvt.f32.s32 %v498_v13 }
 0x345   :  { %v500_v15 = vsel %vm499_vm7, %v495_v14, inf }
 0x346   :  { %501 = vmin.xlane.f32.xlu1 %v500_v15  ;;  %v505_v32 = vshll.u32 %v504_v26, 16  ;;  %v1366_v26 = vld [vmem:[#allocation8 + $0x80] ss:$12 sps:$4 sm:$0xff]  }
 0x3cf   :  { %v488_v25 = vpop.xlane.xlu0 %487 }
 0x3d0   :  { %v489_v27 = vcvt.f32.s32 %v488_v25  ;;  %v1365_v25 = vld [vmem:[#allocation8 + $0x68] ss:$12 sps:$4 sm:$0xff]  }
 0x3d2   :  { %v492_v34 = vadd.s32 %v491_v29, %v489_v27 }
 0x3d3   :  { %v502_v31 = vpop.xlane.xlu1 %501 }
 0x3d4   :  { %v503_v35 = vcvt.f32.s32 %v502_v31  ;;  %vm507_vm8 = vcmp.eq.s32.totalorder %v1630_v39, %v492_v34 }
 0x3d6   :  { %v506_v36 = vadd.s32 %v505_v32, %v503_v35 }
 0x3d8   :  { %vm508_vm9 = vcmp.eq.s32.totalorder %v1630_v39, %v506_v36 }
 0x3d9   :  { %vm1069_vm10 = vmpackc.low %vm508_vm9, %vm507_vm8 }
 0x3da   :  { %1212 = vmatmul.mubr.msk.bf16.vlgmr.msra.gmra.mrb[4].mxu1 %vm1069_vm10, %v1498_v38 }
 0x3db   :  { %1251 = vmatprep.mubr.msk.bf16.mxu1 %vm1497_vm0, %v1496_v1  ;;  %1236 = vmatpush3.bf16.msra.mxu1 %v1353_v5 }
 0x3dc   :  { %1237 = vmatprep.subr.bf16.mxu1 %v1496_v1 }
 0x3df   :  { %1238 = vmatpush3.bf16.msra.mxu1 %v1354_v6 }
 0x3e0   :  { %1239 = vmatprep.subr.bf16.mxu1 %v1496_v1 }
 0x3e3   :  { %1240 = vmatpush3.bf16.msra.mxu1 %v1355_v7 }
 0x3e4   :  { %1241 = vmatprep.subr.bf16.mxu1 %v1496_v1 }
 0x3e7   :  { %1242 = vmatpush3.bf16.msra.mxu1 %v1356_v8 }
 0x3e8   :  { %1243 = vmatprep.subr.bf16.mxu1 %v1496_v1 }
 0x3eb   :  { %1244 = vmatpush3.bf16.msra.mxu1 %v1357_v9 }
 0x3ec   :  { %1245 = vmatprep.subr.bf16.mxu1 %v1496_v1 }
 0x3ef   :  { %1246 = vmatpush3.bf16.msra.mxu1 %v1358_v10 }
 0x3f0   :  { %1247 = vmatprep.subr.bf16.mxu1 %v1496_v1 }
 0x3f3   :  { %1248 = vmatpush3.bf16.msra.mxu1 %v1359_v19 }
 0x3f4   :  { %1249 = vmatprep.subr.bf16.mxu1 %v1496_v1 }
 0x3f7   :  { %1250 = vmatpush3.bf16.msra.mxu1 %v1360_v20 }
 0x4ad   :  { %v612_v45 = vpop.f32.mrb[4].mxu1 }
 0x4ae   :  { %v619_v47 = vadd.f32 %v612_v45, %v302_v44  ;;  %v1213_v48 = vpop.f32.mrb[5].mxu1  ;;  %v1368_v44 = vld [vmem:[#allocation8 + $0xb0] ss:$12 sps:$4 sm:$0xff]   ;;  %v126_v45 = vsub.s32 2, %v1615_v28 }
 0x4af   :  { %v615_v49 = vpop.f32.mrb[6].mxu1 }
 0x4b0   :  { %v620_v50 = vadd.f32 %v615_v49, %v306_v46  ;;  %v1214_v51 = vpop.f32.mrb[7].mxu1  ;;  %v127_v46 = vrot.slane %v1621_v30, %v126_v45 }
 0x4b2   :  { %v621_v52 = vpack.c.bf16 %v620_v50, %v619_v47 }
 0x4b4   :  { %1232 = vmatmul.mubr.bf16.vlgmr.msra.gmra.mrb[8].mxu0 %v621_v52 }
 0x4b5   :  { %1271 = vmatprep.mubr.msk.bf16.mxu0 %vm1497_vm0, %v1496_v1  ;;  %1256 = vmatpush3.bf16.msra.mxu0 %v1361_v21 }
 0x4b6   :  { %1257 = vmatprep.subr.bf16.mxu0 %v1496_v1 }
 0x4b9   :  { %1258 = vmatpush3.bf16.msra.mxu0 %v1362_v22 }
 0x4ba   :  { %1259 = vmatprep.subr.bf16.mxu0 %v1496_v1 }
 0x4bd   :  { %1260 = vmatpush3.bf16.msra.mxu0 %v1363_v23 }
 0x4be   :  { %1261 = vmatprep.subr.bf16.mxu0 %v1496_v1 }
 0x4c1   :  { %1262 = vmatpush3.bf16.msra.mxu0 %v1364_v24 }
 0x4c2   :  { %1263 = vmatprep.subr.bf16.mxu0 %v1496_v1 }
 0x4c5   :  { %1264 = vmatpush3.bf16.msra.mxu0 %v1365_v25 }
 0x4c6   :  { %1265 = vmatprep.subr.bf16.mxu0 %v1496_v1 }
 0x4c9   :  { %1266 = vmatpush3.bf16.msra.mxu0 %v1366_v26 }
 0x4ca   :  { %1267 = vmatprep.subr.bf16.mxu0 %v1496_v1 }
 0x4cd   :  { %1268 = vmatpush3.bf16.msra.mxu0 %v1367_v43 }
 0x4ce   :  { %1269 = vmatprep.subr.bf16.mxu0 %v1496_v1 }
 0x4d1   :  { %1270 = vmatpush3.bf16.msra.mxu0 %v1368_v44 }
 0x587   :  { %v727_v54 = vpop.f32.mrb[8].mxu0 }
 0x588   :  { %v728_v33 = vadd.f32 %v1071_v53, %v727_v54  ;;  %v1233_v55 = vpop.f32.mrb[9].mxu0 }
 0x589   :  { %v730_v37 = vpop.f32.mrb[10].mxu0 }
 0x58a   :  { %734 = vst [vmem:[#allocation10 + $0x8] sm:$0xff] %v728_v33  ;;  %v731_v56 = vadd.f32 %v1071_v53, %v730_v37  ;;  %v1234_v57 = vpop.f32.mrb[11].mxu0  ;;  %v737_v58 = vsel %vm736_vm11, %v728_v33, -inf }
 0x58b   :  { %739 = vmax.xlane.f32.xlu0 %v737_v58 }
 0x58c   :  { %735 = vst [vmem:[#allocation10 + $0x20] sm:$0xff] %v731_v56  ;;  %v738_v59 = vsel %vm736_vm11, %v731_v56, -inf }
 0x58d   :  { %741 = vmax.xlane.f32.xlu1 %v738_v59 }
 0x618   :  { %v740_v60 = vpop.xlane.xlu0 %739 }
 0x619   :  { %vm743_vm12 = vcmp.eq.f32.partialorder %v737_v58, %v740_v60 }
 0x61a   :  { %vm745_vm13 = vmand %vm736_vm11, %vm743_vm12  ;;  %v742_v61 = vpop.xlane.xlu1 %741 }
 0x61b   :  { %v747_v62 = vsel %vm745_vm13, %v1630_v39, 128  ;;  %vm744_vm14 = vcmp.eq.f32.partialorder %v738_v59, %v742_v61 }
 0x61c   :  { %vm746_vm15 = vmand %vm736_vm11, %vm744_vm14  ;;  %v750_v63 = vshra.s32 %v747_v62, 16  ;;  %v749_v11 = vand.u32 65535, %v747_v62 }
 0x61d   :  { %v748_v0 = vsel %vm746_vm15, %v1630_v39, 128 }
 0x61e   :  { %v752_v2 = vcvt.s32.f32 %v750_v63  ;;  %v764_v3 = vshra.s32 %v748_v0, 16  ;;  %v763_v12 = vand.u32 65535, %v748_v0  ;;  %v751_v14 = vcvt.s32.f32 %v749_v11 }
 0x620   :  { %753 = vmin.xlane.f32.xlu0 %v752_v2  ;;  %v766_v4 = vcvt.s32.f32 %v764_v3  ;;  %v765_v17 = vcvt.s32.f32 %v763_v12 }
 0x622   :  { %767 = vmin.xlane.f32.xlu1 %v766_v4 }
 0x6ad   :  { %v754_v13 = vpop.xlane.xlu0 %753 }
 0x6ae   :  { %vm755_vm0 = vcmp.eq.f32.partialorder %v752_v2, %v754_v13  ;;  %v760_v27 = vcvt.f32.s32 %v754_v13 }
 0x6af   :  { %v768_v15 = vpop.xlane.xlu1 %767  ;;  %v756_v16 = vsel %vm755_vm0, %v751_v14, inf }
 0x6b0   :  { %757 = vmin.xlane.f32.xlu0 %v756_v16  ;;  %vm769_vm1 = vcmp.eq.f32.partialorder %v766_v4, %v768_v15  ;;  %v774_v29 = vcvt.f32.s32 %v768_v15  ;;  %v761_v32 = vshll.u32 %v760_v27, 16 }
 0x6b1   :  { %v770_v18 = vsel %vm769_vm1, %v765_v17, inf }
 0x6b2   :  { %771 = vmin.xlane.f32.xlu1 %v770_v18  ;;  %v775_v36 = vshll.u32 %v774_v29, 16 }
 0x73d   :  { %v758_v31 = vpop.xlane.xlu0 %757 }
 0x73e   :  { %v759_v34 = vcvt.f32.s32 %v758_v31 }
 0x73f   :  { %v772_v35 = vpop.xlane.xlu1 %771 }
 0x740   :  { %v762_v40 = vadd.s32 %v761_v32, %v759_v34  ;;  %v773_v41 = vcvt.f32.s32 %v772_v35 }
 0x742   :  { %v776_v42 = vadd.s32 %v775_v36, %v773_v41  ;;  %vm777_vm2 = vcmp.eq.s32.totalorder %v1630_v39, %v762_v40 }
 0x744   :  { %vm778_vm3 = vcmp.eq.s32.totalorder %v1630_v39, %v776_v42 }
 0x745   :  { %vm1090_vm4 = vmpackc.low %vm778_vm3, %vm777_vm2 }
 0x746   :  { %1252 = vmatmul.mubr.msk.bf16.vlgmr.msra.gmra.mrb[0].mxu1 %vm1090_vm4, %v1498_v38  ;;  %v1092_v38 = vld [vmem:[%s1737_s5 + $0x2] ss:$0 sm:$0xff] }
 0x819   :  { %v882_v47 = vpop.f32.mrb[0].mxu1 }
 0x81a   :  { %v1253_v48 = vpop.f32.mrb[1].mxu1  ;;  %v1275_v50 = vadd.f32 %v882_v47, %v127_v46 }
 0x81b   :  { %v885_v49 = vpop.f32.mrb[2].mxu1 }
 0x81c   :  { %v1276_v51 = vadd.f32 %v885_v49, %v127_v46  ;;  %v1254_v52 = vpop.f32.mrb[3].mxu1 }
 0x81e   :  { %v891_v39 = vpack.c.bf16 %v1276_v51, %v1275_v50 }
 0x820   :  { %1272 = vmatmul.mubr.bf16.vlgmr.msra.gmra.mrb[12].mxu0 %v891_v39 }
 0x8f3   :  { %v997_v1 = vpop.f32.mrb[12].mxu0 }
 0x8f4   :  { %v998_v53 = vadd.f32 %v1092_v38, %v997_v1  ;;  %v1273_v54 = vpop.f32.mrb[13].mxu0 }
 0x8f5   :  { %v1000_v28 = vpop.f32.mrb[14].mxu0 }
 0x8f6   :  { %1004 = vst [vmem:[#allocation10 + $0x10] sm:$0xff] %v998_v53  ;;  %v1001_v30 = vadd.f32 %v1092_v38, %v1000_v28  ;;  %v1274_v33 = vpop.f32.mrb[15].mxu0 }
 0x8f8   :  { %1005 = vst [vmem:[#allocation10 + $0x28] sm:$0xff] %v1001_v30 }
 0x8f9   :  { %1468 = shalt.err (!%p1465_p8)
}
 0x8fa   :  { %s1469_s9 = scalar_lea.hbm %s1738_s6, 768 }
 0x8fb   :  { %p1470_p9 = scmp.ne.s32.totalorder %s1738_s6, %s1469_s9  ;;  %p1473_p10 = scmp.lt.u32.totalorder %s1469_s9, %s1738_s6 }
 0x8fd   :  { %p1475_p11 = pnand %p1473_p10, %p1470_p9 }
 0x8ff   :  { %1478 = shalt.err (!%p1475_p11)
}
 0x900   :  { %s1500_s12 = smov 384   ;;  %s1501_s14 = smov 24  }
 0x901   :  { %1017 = dma.vmem_to_hbm [thread:$0]  %s1012_s28, 768, %s1738_s6, [#allocation4], %s1500_s12, %s1500_s12, %s1501_s14  }
 0x902   :  { %1485 = dma.done.wait [#allocation4], 768  }
 0x903   :  { %1486 = vsyncadd [#allocation4], 4294966528 }
 0x904   :  { %1021 = vsyncpa [#allocation3], 1 }
 0x905   :  { %1022 = vsyncpa [#allocation6], 1 }
 0x906   :  { %1023 = vsyncpa [#allocation9], 1 }
 0x907   :  { %1024 = vsyncpa [#allocation4], 1 }

</bundles_post_ra>
